<compile_context>
chip_gen: v6e
topology: v6e:2x2x1
jax: 0.10.0
libtpu: 0.0.40
codegen_flags: <defaults>
</compile_context>

<pallas_src>
import functools

import jax
import jax.numpy as jnp
from jax.experimental import pallas as pl
from jax.experimental.pallas import tpu as pltpu


# ---------------------------------------------------------------------------
# Fused Conv (im2col GEMM) + train-mode BatchNorm + ReLU — one Pallas kernel.
# ---------------------------------------------------------------------------
def _conv_bn_relu_kernel(a_ref, w_ref, g_ref, b_ref, o_ref, *, count, eps):
    # GEMM on the MXU (bf16 operands, f32 accumulation).
    y = jnp.dot(a_ref[...], w_ref[...], preferred_element_type=jnp.float32)
    # Train-mode BN: biased batch statistics over all N*OH*OW positions.
    s = jnp.sum(y, axis=0, keepdims=True)
    q = jnp.sum(y * y, axis=0, keepdims=True)
    mean = s * (1.0 / count)
    var = jnp.maximum(q * (1.0 / count) - mean * mean, 0.0)
    scale = g_ref[...] * jax.lax.rsqrt(var + eps)
    shift = b_ref[...] - mean * scale
    o_ref[...] = jnp.maximum(y * scale + shift, 0.0)


def _im2col(x_nhwc, kh, kw, stride, pad):
    """Patch extraction (pure data rearrangement) done in the JAX wrapper."""
    n, h, w, c = x_nhwc.shape
    xp = jnp.pad(x_nhwc, ((0, 0), (pad, pad), (pad, pad), (0, 0)))
    oh = (h + 2 * pad - kh) // stride + 1
    ow = (w + 2 * pad - kw) // stride + 1
    cols = []
    for i in range(kh):
        for j in range(kw):
            cols.append(jax.lax.slice(
                xp, (0, i, j, 0),
                (n, i + (oh - 1) * stride + 1, j + (ow - 1) * stride + 1, c),
                (1, stride, stride, 1)))
    patches = jnp.concatenate(cols, axis=-1)            # (N, OH, OW, kh*kw*C)
    return patches.reshape(n * oh * ow, kh * kw * c), oh, ow


def conv_bn_relu(x_nhwc, w_oihw, gamma, beta, *, stride, eps=1e-5):
    """Conv2d(bias=False) + BatchNorm2d (training mode) + ReLU, NHWC."""
    n = x_nhwc.shape[0]
    oc, ic, kh, kw = w_oihw.shape
    assert ic == x_nhwc.shape[-1]
    a, oh, ow = _im2col(x_nhwc, kh, kw, stride, pad=kh // 2)
    m, k = a.shape
    wmat = jnp.transpose(w_oihw, (2, 3, 1, 0)).reshape(k, oc)  # taps x ic -> oc
    kern = functools.partial(_conv_bn_relu_kernel, count=float(m), eps=eps)
    # Everything fits a single VMEM block at these sizes (M<=512, K<=288),
    # so no grid / pipelining is needed.
    out = pl.pallas_call(
        kern,
        out_shape=jax.ShapeDtypeStruct((m, oc), jnp.float32),
    )(a.astype(jnp.bfloat16), wmat.astype(jnp.bfloat16),
      gamma.reshape(1, oc).astype(jnp.float32),
      beta.reshape(1, oc).astype(jnp.float32))
    return out.reshape(n, oh, ow, oc)


# ---------------------------------------------------------------------------
# compresser_att (neko_att_ap): attention-weighted spatial pooling.
# ---------------------------------------------------------------------------
def _att_pool_kernel(x_ref, w_ref, o_ref):
    x = x_ref[...]                                            # (HW, C)
    logits = jnp.sum(x * w_ref[...], axis=-1, keepdims=True)  # (HW, 1)
    mx = jnp.max(logits, axis=0, keepdims=True)
    e = jnp.exp(logits - mx)
    z = jnp.sum(e, axis=0, keepdims=True)
    p = e / z                                                 # spatial softmax
    o_ref[...] = jnp.sum(p * x, axis=0, keepdims=True)        # (1, C)


def att_pool(x_nhwc, w_att):
    # TODO(synk): exact neko_att_ap definition is not in the reference file;
    # implemented as a 1x1 conv (C -> 1) producing spatial attention logits,
    # softmax over spatial positions, attention-weighted average pooling
    # (a conv bias would be softmax-invariant, so it is omitted).
    n, h, w, c = x_nhwc.shape
    x = x_nhwc.reshape(n, h * w, c)
    out = pl.pallas_call(
        _att_pool_kernel,
        out_shape=jax.ShapeDtypeStruct((n, 1, c), jnp.float32),
        grid=(n,),
        in_specs=[pl.BlockSpec((None, h * w, c), lambda b: (b, 0, 0)),
                  pl.BlockSpec((1, c), lambda b: (0, 0))],
        out_specs=pl.BlockSpec((None, 1, c), lambda b: (b, 0, 0)),
        compiler_params=pltpu.CompilerParams(
            dimension_semantics=("parallel",)),
    )(x, w_att.reshape(1, c).astype(jnp.float32))
    return out.reshape(n, c)


# ---------------------------------------------------------------------------
# fc = nn.Linear(feature_cnt, feature_cnt): tiny GEMM + bias kernel.
# ---------------------------------------------------------------------------
def _linear_kernel(x_ref, w_ref, b_ref, o_ref):
    o_ref[...] = (jnp.dot(x_ref[...], w_ref[...],
                          preferred_element_type=jnp.float32) + b_ref[...])


def linear(x, w_in_out, bias):
    m, k = x.shape
    k2, n = w_in_out.shape
    assert k == k2
    return pl.pallas_call(
        _linear_kernel,
        out_shape=jax.ShapeDtypeStruct((m, n), jnp.float32),
    )(x.astype(jnp.float32), w_in_out.astype(jnp.float32),
      bias.reshape(1, n).astype(jnp.float32))


# ---------------------------------------------------------------------------
# Default `core`: small conv backbone, returns the list of stage feature maps.
# ---------------------------------------------------------------------------
def init_mini_backbone_params(key, in_ch, feature_cnt):
    chans = (16, 32, feature_cnt)
    strides = (1, 2, 2)
    keys = jax.random.split(key, len(chans))
    stages = []
    c_in = in_ch
    for k, c_out, s in zip(keys, chans, strides):
        fan = c_in * 9
        stages.append({
            "w": (jax.random.normal(k, (c_out, c_in, 3, 3), jnp.float32)
                  * (2.0 / fan) ** 0.5),
            "gamma": jnp.ones((c_out,), jnp.float32),
            "beta": jnp.zeros((c_out,), jnp.float32),
            "stride": s,
        })
        c_in = c_out
    return {"stages": stages}


def mini_backbone(params, x_nchw):
    """Training-mode feature extractor; returns the list of NHWC stage maps
    (so `core(view)[-1]` is the feature_cnt-channel map)."""
    x = jnp.transpose(x_nchw.astype(jnp.float32), (0, 2, 3, 1))   # NCHW->NHWC
    feats = []
    for st in params["stages"]:
        x = conv_bn_relu(x, st["w"], st["gamma"], st["beta"],
                         stride=st["stride"])
        feats.append(x)
    return feats


# ---------------------------------------------------------------------------
# The module wrapper (faithful to the PyTorch class).
# ---------------------------------------------------------------------------
class NekoWeirdVisualOnlyInterprinter:
    """forward(view) = fc(att_pool(core(view)[-1])); BatchNorm always runs in
    training mode (the reference forward calls `self.core[0].train()`)."""

    def __init__(self, feature_cnt, core=None, key=None, in_ch=4):
        if key is None:
            key = jax.random.PRNGKey(42)
        kb, ka, kf, kfb = jax.random.split(key, 4)
        if core is None:
            self._backbone_params = init_mini_backbone_params(
                kb, in_ch, feature_cnt)
            core = functools.partial(mini_backbone, self._backbone_params)
        self.core = core
        self.feature_cnt = feature_cnt
        self.att_w = (jax.random.normal(ka, (feature_cnt,), jnp.float32)
                      * (1.0 / feature_cnt) ** 0.5)
        # nn.Linear(feature_cnt, feature_cnt); weight stored as (in, out).
        self.fc_w = (jax.random.normal(kf, (feature_cnt, feature_cnt),
                                       jnp.float32)
                     * (1.0 / feature_cnt) ** 0.5)
        self.fc_b = (jax.random.normal(kfb, (feature_cnt,), jnp.float32)
                     * 0.01)

    def __call__(self, view):
        feats = self.core(view)               # training-mode backbone
        vp = feats[-1]                        # last feature map (NHWC)
        assert vp.shape[-1] == self.feature_cnt
        pooled = att_pool(vp, self.att_w)     # (N, feature_cnt)
        return linear(pooled, self.fc_w, self.fc_b)


if __name__ == "__main__":
    key = jax.random.PRNGKey(0)
    kx, kp = jax.random.split(key)
    # Small NCHW input; default core's last stage has feature_cnt channels.
    x = jax.random.normal(kx, (2, 4, 16, 16), jnp.float32)
    model = NekoWeirdVisualOnlyInterprinter(feature_cnt=64, key=kp, in_ch=4)
    out = jax.block_until_ready(model(x))
    assert out.shape == (2, 64), out.shape
    assert bool(jnp.all(jnp.isfinite(out)))
    print("KERNEL_OK")
</pallas_src>

<mosaic_0001>
module attributes {stable_mosaic.version = 11 : i64} {
  func.func @_conv_bn_relu_kernel(%arg0: memref<512x36xbf16, #tpu.memory_space<vmem>>, %arg1: memref<36x16xbf16, #tpu.memory_space<vmem>>, %arg2: memref<1x16xf32, #tpu.memory_space<vmem>>, %arg3: memref<1x16xf32, #tpu.memory_space<vmem>>, %arg4: memref<512x16xf32, #tpu.memory_space<vmem>>) attributes {dimension_semantics = [], scalar_prefetch = 0 : i64, scratch_operands = 0 : i64, tpu.core_type = #tpu.core_type<tc>} {
    %c0 = arith.constant 0 : index
    %c0_0 = arith.constant 0 : index
    %0 = vector.load %arg0[%c0, %c0_0] : memref<512x36xbf16, #tpu.memory_space<vmem>>, vector<512x36xbf16>
    %c0_1 = arith.constant 0 : index
    %c0_2 = arith.constant 0 : index
    %1 = vector.load %arg1[%c0_1, %c0_2] : memref<36x16xbf16, #tpu.memory_space<vmem>>, vector<36x16xbf16>
    %cst = arith.constant dense<0.000000e+00> : vector<512x16xf32>
    %2 = tpu.matmul %0, %1, %cst {dimension_numbers = #tpu.dot_dimension_numbers<[1], [0], [0], [1], [0, 0, 1, 1], [], []>} : vector<512x36xbf16>, vector<36x16xbf16>, vector<512x16xf32> -> vector<512x16xf32>
    %cst_3 = arith.constant dense<0.000000e+00> : vector<16xf32>
    %3 = vector.multi_reduction <add>, %2, %cst_3 [0] : vector<512x16xf32> to vector<16xf32>
    %4 = vector.shape_cast %3 : vector<16xf32> to vector<1x16xf32>
    %5 = arith.mulf %2, %2 : vector<512x16xf32>
    %cst_4 = arith.constant dense<0.000000e+00> : vector<16xf32>
    %6 = vector.multi_reduction <add>, %5, %cst_4 [0] : vector<512x16xf32> to vector<16xf32>
    %7 = vector.shape_cast %6 : vector<16xf32> to vector<1x16xf32>
    %cst_5 = arith.constant 0.001953125 : f32
    %8 = vector.broadcast %cst_5 : f32 to vector<1x16xf32>
    %9 = arith.mulf %4, %8 : vector<1x16xf32>
    %cst_6 = arith.constant 0.001953125 : f32
    %10 = vector.broadcast %cst_6 : f32 to vector<1x16xf32>
    %11 = arith.mulf %7, %10 : vector<1x16xf32>
    %12 = arith.mulf %9, %9 : vector<1x16xf32>
    %13 = arith.subf %11, %12 : vector<1x16xf32>
    %cst_7 = arith.constant 0.000000e+00 : f32
    %14 = vector.broadcast %cst_7 : f32 to vector<1x16xf32>
    %15 = arith.maximumf %13, %14 : vector<1x16xf32>
    %c0_8 = arith.constant 0 : index
    %c0_9 = arith.constant 0 : index
    %16 = vector.load %arg2[%c0_8, %c0_9] : memref<1x16xf32, #tpu.memory_space<vmem>>, vector<1x16xf32>
    %cst_10 = arith.constant 9.99999974E-6 : f32
    %17 = vector.broadcast %cst_10 : f32 to vector<1x16xf32>
    %18 = arith.addf %15, %17 : vector<1x16xf32>
    %19 = math.rsqrt %18 : vector<1x16xf32>
    %20 = arith.mulf %16, %19 : vector<1x16xf32>
    %c0_11 = arith.constant 0 : index
    %c0_12 = arith.constant 0 : index
    %21 = vector.load %arg3[%c0_11, %c0_12] : memref<1x16xf32, #tpu.memory_space<vmem>>, vector<1x16xf32>
    %22 = arith.mulf %9, %20 : vector<1x16xf32>
    %23 = arith.subf %21, %22 : vector<1x16xf32>
    %24 = vector.broadcast %20 : vector<1x16xf32> to vector<512x16xf32>
    %25 = arith.mulf %2, %24 : vector<512x16xf32>
    %26 = vector.broadcast %23 : vector<1x16xf32> to vector<512x16xf32>
    %27 = arith.addf %25, %26 : vector<512x16xf32>
    %cst_13 = arith.constant 0.000000e+00 : f32
    %28 = vector.broadcast %cst_13 : f32 to vector<512x16xf32>
    %29 = arith.maximumf %27, %28 : vector<512x16xf32>
    %c0_14 = arith.constant 0 : index
    %c0_15 = arith.constant 0 : index
    %30 = vector.load %arg4[%c0_14, %c0_15] : memref<512x16xf32, #tpu.memory_space<vmem>>, vector<512x16xf32>
    tpu.vector_store %arg4[%c0_14, %c0_15], %29 {strides = array<i32>} : memref<512x16xf32, #tpu.memory_space<vmem>>, vector<512x16xf32>,
    return
  }
}

</mosaic_0001>

<bundles_post_ra>
// kernel: tpu_custom_call.1
= control target key start
LH: loop header
LB: loop body
LE: loop exit
PB: predicated region body
PF: predicated region fallthrough
CT: control target
= control target key end

     0   :  { %vm359_vm0 = vcmask 1041408   ;;  %vm262_vm1 = vcmask 293888   ;;  %vm652_vm2 = vcmask 130048   ;;  %s2949_s1 = inlined_call_operand.vmem [shape: bf16[36,16], index: 1, kind: input, shape index: {}]   ;;  %s2950_s0 = inlined_call_operand.vmem [shape: bf16[512,36], index: 0, kind: input, shape index: {}]   ;;  %s2951_s2 = inlined_call_operand.vmem [shape: f32[1,16], index: 2, kind: input, shape index: {}]   ;;  %s2952_s3 = inlined_call_operand.vmem [shape: f32[1,16], index: 3, kind: input, shape index: {}]   ;;  %s2953_s4 = inlined_call_operand.vmem [shape: f32[512,16], index: 4, kind: output, shape index: {}]  }
   0x1   :  { %v1447_v0 = vld [vmem:[%s2949_s1 + $0x10] ss:$0 sps:$4 sm:$0x33]   ;;  %v1448_v1 = vld [vmem:[%s2949_s1 + $0x8] sm:$0xff]   ;;  %v1450_v3 = vld [vmem:[%s2950_s0] sm:$0xff]  }
   0x2   :  { %1445 = vmatprep.subr.msk.bf16.mxu0 %vm359_vm0, %v1447_v0  ;;  %v361_v2 = vsel %vm359_vm0, %v1447_v0, 0  ;;  %1446 = vmatprep.subr.msk.bf16.mxu1 %vm359_vm0, %v1447_v0  ;;  %v1449_v4 = vld [vmem:[%s2949_s1] sm:$0xff]   ;;  %v1451_v5 = vld [vmem:[%s2950_s0 + $0x8] sm:$0xff]   ;;  %v1452_v6 = vld [vmem:[%s2950_s0 + $0x10] sm:$0xff]  }
   0x3   :  { %1370 = vmatpush3.bf16.msra.mxu0 %v361_v2  ;;  %1442 = vmatpush3.bf16.msra.mxu1 %v361_v2  ;;  %v1453_v7 = vld [vmem:[%s2950_s0 + $0x18] sm:$0xff]   ;;  %v1454_v8 = vld [vmem:[%s2950_s0 + $0x20] sm:$0xff]   ;;  %v1467_v10 = vld [vmem:[%s2950_s0 + $0x88] sm:$0xff]  }
   0x4   :  { %1371 = vmatprep.subr.bf16.mxu0 %v1448_v1  ;;  %1440 = vmatprep.subr.bf16.mxu1 %v1448_v1  ;;  %v1466_v9 = vld [vmem:[%s2950_s0 + $0x80] sm:$0xff]   ;;  %v1468_v11 = vld [vmem:[%s2950_s0 + $0x90] sm:$0xff]   ;;  %v1455_v12 = vld [vmem:[%s2950_s0 + $0x28] sm:$0xff]  }
   0x5   :  { %1375 = vmatprep.mubr.msk.bf16.mxu0 %vm262_vm1, %v1450_v3  ;;  %1407 = vmatprep.mubr.msk.bf16.mxu1 %vm262_vm1, %v1466_v9  ;;  %v1456_v13 = vld [vmem:[%s2950_s0 + $0x30] sm:$0xff]   ;;  %v1469_v14 = vld [vmem:[%s2950_s0 + $0x98] sm:$0xff]   ;;  %v1470_v15 = vld [vmem:[%s2950_s0 + $0xa0] sm:$0xff]  }
   0x6   :  { %v1457_v16 = vld [vmem:[%s2950_s0 + $0x38] sm:$0xff]   ;;  %v1471_v17 = vld [vmem:[%s2950_s0 + $0xa8] sm:$0xff]   ;;  %v1458_v18 = vld [vmem:[%s2950_s0 + $0x40] sm:$0xff]  }
   0x7   :  { %1372 = vmatpush3.bf16.msra.mxu0 %v1448_v1  ;;  %1443 = vmatpush3.bf16.msra.mxu1 %v1448_v1  ;;  %v1472_v19 = vld [vmem:[%s2950_s0 + $0xb0] sm:$0xff]   ;;  %v1459_v20 = vld [vmem:[%s2950_s0 + $0x48] sm:$0xff]   ;;  %v1473_v21 = vld [vmem:[%s2950_s0 + $0xb8] sm:$0xff]  }
   0x8   :  { %1373 = vmatprep.subr.bf16.mxu0 %v1449_v4  ;;  %1441 = vmatprep.subr.bf16.mxu1 %v1449_v4  ;;  %v1460_v22 = vld [vmem:[%s2950_s0 + $0x50] sm:$0xff]   ;;  %v1474_v23 = vld [vmem:[%s2950_s0 + $0xc0] sm:$0xff]   ;;  %v1461_v24 = vld [vmem:[%s2950_s0 + $0x58] sm:$0xff]  }
   0x9   :  { %v1475_v25 = vld [vmem:[%s2950_s0 + $0xc8] sm:$0xff]   ;;  %v1462_v26 = vld [vmem:[%s2950_s0 + $0x60] sm:$0xff]   ;;  %v1476_v27 = vld [vmem:[%s2950_s0 + $0xd0] sm:$0xff]  }
   0xa   :  { %v1463_v28 = vld [vmem:[%s2950_s0 + $0x68] sm:$0xff]   ;;  %v1477_v29 = vld [vmem:[%s2950_s0 + $0xd8] sm:$0xff]   ;;  %v1464_v30 = vld [vmem:[%s2950_s0 + $0x70] sm:$0xff]  }
   0xb   :  { %1374 = vmatpush3.bf16.msra.mxu0 %v1449_v4  ;;  %1444 = vmatpush3.bf16.msra.mxu1 %v1449_v4  ;;  %v1478_v31 = vld [vmem:[%s2950_s0 + $0xe0] sm:$0xff]   ;;  %v1465_v32 = vld [vmem:[%s2950_s0 + $0x78] sm:$0xff]   ;;  %v1479_v33 = vld [vmem:[%s2950_s0 + $0xe8] sm:$0xff]  }
   0xc   :  { %v1480_v34 = vld [vmem:[%s2950_s0 + $0xf0] sm:$0xff]   ;;  %v1481_v35 = vld [vmem:[%s2950_s0 + $0xf8] sm:$0xff]  }
   0xe   :  { %1376 = vmatmul.mubr.msk.bf16.vlgmr.msra.gmra.mxu0 %vm262_vm1, %v1451_v5  ;;  %1408 = vmatmul.mubr.msk.bf16.vlgmr.msra.gmra.mxu1 %vm262_vm1, %v1467_v10 }
   0xf   :  { %1379 = vmatprep.mubr.msk.bf16.mxu0 %vm262_vm1, %v1452_v6  ;;  %1411 = vmatprep.mubr.msk.bf16.mxu1 %vm262_vm1, %v1468_v11 }
  0x16   :  { %1380 = vmatmul.mubr.msk.bf16.gmra.mxu0 %vm262_vm1, %v1453_v7  ;;  %1412 = vmatmul.mubr.msk.bf16.gmra.mxu1 %vm262_vm1, %v1469_v14 }
  0x17   :  { %1383 = vmatprep.mubr.msk.bf16.mxu0 %vm262_vm1, %v1454_v8  ;;  %1415 = vmatprep.mubr.msk.bf16.mxu1 %vm262_vm1, %v1470_v15 }
  0x1e   :  { %1384 = vmatmul.mubr.msk.bf16.gmra.mxu0 %vm262_vm1, %v1455_v12  ;;  %1416 = vmatmul.mubr.msk.bf16.gmra.mxu1 %vm262_vm1, %v1471_v17 }
  0x1f   :  { %1387 = vmatprep.mubr.msk.bf16.mxu0 %vm262_vm1, %v1456_v13  ;;  %1419 = vmatprep.mubr.msk.bf16.mxu1 %vm262_vm1, %v1472_v19 }
  0x26   :  { %1388 = vmatmul.mubr.msk.bf16.gmra.mxu0 %vm262_vm1, %v1457_v16  ;;  %1420 = vmatmul.mubr.msk.bf16.gmra.mxu1 %vm262_vm1, %v1473_v21 }
  0x27   :  { %1391 = vmatprep.mubr.msk.bf16.mxu0 %vm262_vm1, %v1458_v18  ;;  %1423 = vmatprep.mubr.msk.bf16.mxu1 %vm262_vm1, %v1474_v23 }
  0x2e   :  { %1392 = vmatmul.mubr.msk.bf16.gmra.mxu0 %vm262_vm1, %v1459_v20  ;;  %1424 = vmatmul.mubr.msk.bf16.gmra.mxu1 %vm262_vm1, %v1475_v25 }
  0x2f   :  { %1395 = vmatprep.mubr.msk.bf16.mxu0 %vm262_vm1, %v1460_v22  ;;  %1427 = vmatprep.mubr.msk.bf16.mxu1 %vm262_vm1, %v1476_v27 }
  0x36   :  { %1396 = vmatmul.mubr.msk.bf16.gmra.mxu0 %vm262_vm1, %v1461_v24  ;;  %1428 = vmatmul.mubr.msk.bf16.gmra.mxu1 %vm262_vm1, %v1477_v29 }
  0x37   :  { %1399 = vmatprep.mubr.msk.bf16.mxu0 %vm262_vm1, %v1462_v26  ;;  %1431 = vmatprep.mubr.msk.bf16.mxu1 %vm262_vm1, %v1478_v31 }
  0x3e   :  { %1400 = vmatmul.mubr.msk.bf16.gmra.mxu0 %vm262_vm1, %v1463_v28  ;;  %1432 = vmatmul.mubr.msk.bf16.gmra.mxu1 %vm262_vm1, %v1479_v33 }
  0x3f   :  { %1403 = vmatprep.mubr.msk.bf16.mxu0 %vm262_vm1, %v1464_v30  ;;  %1435 = vmatprep.mubr.msk.bf16.mxu1 %vm262_vm1, %v1480_v34 }
  0x46   :  { %1404 = vmatmul.mubr.msk.bf16.gmra.mxu0 %vm262_vm1, %v1465_v32  ;;  %1436 = vmatmul.mubr.msk.bf16.gmra.mxu1 %vm262_vm1, %v1481_v35 }
  0xce   :  { %v1646_v36 = vpop.f32.mrf.mxu0  ;;  %v1666_v47 = vpop.f32.mrf.mxu1 }
  0xcf   :  { %v788_v41 = vmul.f32 %v1646_v36, %v1646_v36  ;;  %2979 = vst [vmem:[#allocation2_spill] sm:$0xff] %v1666_v47  ;;  %v656_v48 = vsel %vm652_vm2, %v1646_v36, 0.0 }
  0xd0   :  { %v1648_v37 = vpop.f32.mrf.mxu0  ;;  %v1676_v55 = vpop.f32.mrf.mxu1 }
  0xd1   :  { %v786_v39 = vmul.f32 %v1648_v37, %v1648_v37  ;;  %v653_v42 = vsel %vm652_vm2, %v1648_v37, 0.0  ;;  %2980 = vst [vmem:[#allocation3_spill] sm:$0xff] %v1676_v55  ;;  %v853_v56 = vsel %vm652_vm2, %v788_v41, 0.0 }
  0xd2   :  { %v1650_v38 = vpop.f32.mrf.mxu0  ;;  %v1685_v62 = vpop.f32.mrf.mxu1 }
  0xd3   :  { %v850_v49 = vsel %vm652_vm2, %v786_v39, 0.0  ;;  %v789_v50 = vmul.f32 %v1650_v38, %v1650_v38  ;;  %v658_v57 = vsel %vm652_vm2, %v1650_v38, 0.0 }
  0xd4   :  { %v1654_v40 = vpop.f32.mrf.mxu0  ;;  %v1692_v4 = vpop.f32.mrf.mxu1 }
  0xd5   :  { %v654_v43 = vsel %vm652_vm2, %v1654_v40, 0.0  ;;  %v787_v44 = vmul.f32 %v1654_v40, %v1654_v40  ;;  %v855_v63 = vsel %vm652_vm2, %v789_v50, 0.0 }
  0xd6   :  { %v655_v45 = vadd.f32 %v654_v43, %v653_v42  ;;  %v1664_v46 = vpop.f32.mrf.mxu0  ;;  %v1703_v12 = vpop.f32.mrf.mxu1 }
  0xd7   :  { %v851_v51 = vsel %vm652_vm2, %v787_v44, 0.0  ;;  %v792_v5 = vmul.f32 %v1664_v46, %v1664_v46  ;;  %2981 = vst [vmem:[#allocation4_spill] sm:$0xff] %v1703_v12  ;;  %v664_v13 = vsel %vm652_vm2, %v1664_v46, 0.0 }
  0xd8   :  { %v657_v52 = vadd.f32 %v656_v48, %v655_v45  ;;  %v852_v53 = vadd.f32 %v851_v51, %v850_v49  ;;  %v1674_v54 = vpop.f32.mrf.mxu0  ;;  %v1712_v19 = vpop.f32.mrf.mxu1 }
  0xd9   :  { %v790_v58 = vmul.f32 %v1674_v54, %v1674_v54  ;;  %v660_v0 = vsel %vm652_vm2, %v1674_v54, 0.0  ;;  %2982 = vst [vmem:[#allocation5_spill] sm:$0xff] %v1712_v19  ;;  %v861_v20 = vsel %vm652_vm2, %v792_v5, 0.0 }
  0xda   :  { %v854_v59 = vadd.f32 %v853_v56, %v852_v53  ;;  %v659_v60 = vadd.f32 %v658_v57, %v657_v52  ;;  %v1683_v61 = vpop.f32.mrf.mxu0  ;;  %v1726_v31 = vpop.f32.mrf.mxu1 }
  0xdb   :  { %v857_v6 = vsel %vm652_vm2, %v790_v58, 0.0  ;;  %v793_v14 = vmul.f32 %v1683_v61, %v1683_v61  ;;  %v666_v21 = vsel %vm652_vm2, %v1683_v61, 0.0 }
  0xdc   :  { %v661_v1 = vadd.f32 %v660_v0, %v659_v60  ;;  %v856_v2 = vadd.f32 %v855_v63, %v854_v59  ;;  %v1690_v3 = vpop.f32.mrf.mxu0  ;;  %v1744_v51 = vpop.f32.mrf.mxu1 }
  0xdd   :  { %v662_v7 = vsel %vm652_vm2, %v1690_v3, 0.0  ;;  %v791_v8 = vmul.f32 %v1690_v3, %v1690_v3  ;;  %v863_v26 = vsel %vm652_vm2, %v793_v14, 0.0 }
  0xde   :  { %v858_v9 = vadd.f32 %v857_v6, %v856_v2  ;;  %v663_v10 = vadd.f32 %v662_v7, %v661_v1  ;;  %v1701_v11 = vpop.f32.mrf.mxu0  ;;  %v1758_v5 = vpop.f32.mrf.mxu1 }
  0xdf   :  { %v859_v15 = vsel %vm652_vm2, %v791_v8, 0.0  ;;  %v796_v32 = vmul.f32 %v1701_v11, %v1701_v11  ;;  %v672_v43 = vsel %vm652_vm2, %v1701_v11, 0.0  ;;  %2983 = vst [vmem:[#allocation6_spill] sm:$0xff] %v1758_v5 }
  0xe0   :  { %v665_v16 = vadd.f32 %v664_v13, %v663_v10  ;;  %v860_v17 = vadd.f32 %v859_v15, %v858_v9  ;;  %v1710_v18 = vpop.f32.mrf.mxu0 }
  0xe1   :  { %v794_v22 = vmul.f32 %v1710_v18, %v1710_v18  ;;  %v668_v27 = vsel %vm652_vm2, %v1710_v18, 0.0  ;;  %v869_v52 = vsel %vm652_vm2, %v796_v32, 0.0 }
  0xe2   :  { %v862_v23 = vadd.f32 %v861_v20, %v860_v17  ;;  %v667_v24 = vadd.f32 %v666_v21, %v665_v16  ;;  %v1719_v25 = vpop.f32.mrf.mxu0 }
  0xe3   :  { %v865_v33 = vsel %vm652_vm2, %v794_v22, 0.0  ;;  %v797_v44 = vmul.f32 %v1719_v25, %v1719_v25  ;;  %v674_v53 = vsel %vm652_vm2, %v1719_v25, 0.0 }
  0xe4   :  { %v669_v28 = vadd.f32 %v668_v27, %v667_v24  ;;  %v864_v29 = vadd.f32 %v863_v26, %v862_v23  ;;  %v1724_v30 = vpop.f32.mrf.mxu0  ;;  %v1776_v23 = vpop.f32.mrf.mxu1 }
  0xe5   :  { %v670_v34 = vsel %vm652_vm2, %v1724_v30, 0.0  ;;  %v795_v35 = vmul.f32 %v1724_v30, %v1724_v30  ;;  %v871_v60 = vsel %vm652_vm2, %v797_v44, 0.0  ;;  %2984 = vst [vmem:[#allocation7_spill] sm:$0xff] %v1776_v23 }
  0xe6   :  { %v866_v39 = vadd.f32 %v865_v33, %v864_v29  ;;  %v671_v41 = vadd.f32 %v670_v34, %v669_v28  ;;  %v1735_v42 = vpop.f32.mrf.mxu0 }
  0xe7   :  { %v867_v45 = vsel %vm652_vm2, %v795_v35, 0.0  ;;  %v800_v6 = vmul.f32 %v1735_v42, %v1735_v42  ;;  %v680_v15 = vsel %vm652_vm2, %v1735_v42, 0.0 }
  0xe8   :  { %v673_v48 = vadd.f32 %v672_v43, %v671_v41  ;;  %v868_v49 = vadd.f32 %v867_v45, %v866_v39  ;;  %v1742_v50 = vpop.f32.mrf.mxu0  ;;  %v1790_v43 = vpop.f32.mrf.mxu1 }
  0xe9   :  { %v798_v56 = vmul.f32 %v1742_v50, %v1742_v50  ;;  %v676_v63 = vsel %vm652_vm2, %v1742_v50, 0.0  ;;  %v877_v24 = vsel %vm652_vm2, %v800_v6, 0.0 }
  0xea   :  { %v870_v57 = vadd.f32 %v869_v52, %v868_v49  ;;  %v675_v58 = vadd.f32 %v674_v53, %v673_v48  ;;  %v1751_v59 = vpop.f32.mrf.mxu0  ;;  %v1808_v6 = vpop.f32.mrf.mxu1 }
  0xeb   :  { %v873_v7 = vsel %vm652_vm2, %v798_v56, 0.0  ;;  %v801_v16 = vmul.f32 %v1751_v59, %v1751_v59  ;;  %v682_v26 = vsel %vm652_vm2, %v1751_v59, 0.0 }
  0xec   :  { %v677_v0 = vadd.f32 %v676_v63, %v675_v58  ;;  %v872_v1 = vadd.f32 %v871_v60, %v870_v57  ;;  %v1756_v2 = vpop.f32.mrf.mxu0 }
  0xed   :  { %v678_v8 = vsel %vm652_vm2, %v1756_v2, 0.0  ;;  %v799_v9 = vmul.f32 %v1756_v2, %v1756_v2  ;;  %v879_v33 = vsel %vm652_vm2, %v801_v16, 0.0 }
  0xee   :  { %v874_v10 = vadd.f32 %v873_v7, %v872_v1  ;;  %v679_v13 = vadd.f32 %v678_v8, %v677_v0  ;;  %v1767_v14 = vpop.f32.mrf.mxu0 }
  0xef   :  { %v875_v17 = vsel %vm652_vm2, %v799_v9, 0.0  ;;  %v804_v44 = vmul.f32 %v1767_v14, %v1767_v14  ;;  %v688_v57 = vsel %vm652_vm2, %v1767_v14, 0.0 }
  0xf0   :  { %v681_v20 = vadd.f32 %v680_v15, %v679_v13  ;;  %v876_v21 = vadd.f32 %v875_v17, %v874_v10  ;;  %v1774_v22 = vpop.f32.mrf.mxu0 }
  0xf1   :  { %v802_v27 = vmul.f32 %v1774_v22, %v1774_v22  ;;  %v684_v34 = vsel %vm652_vm2, %v1774_v22, 0.0  ;;  %v885_v7 = vsel %vm652_vm2, %v804_v44, 0.0 }
  0xf2   :  { %v878_v28 = vadd.f32 %v877_v24, %v876_v21  ;;  %v683_v29 = vadd.f32 %v682_v26, %v681_v20  ;;  %v1783_v32 = vpop.f32.mrf.mxu0  ;;  %v1822_v26 = vpop.f32.mrf.mxu1 }
  0xf3   :  { %v881_v45 = vsel %vm652_vm2, %v802_v27, 0.0  ;;  %v805_v58 = vmul.f32 %v1783_v32, %v1783_v32  ;;  %v690_v8 = vsel %vm652_vm2, %v1783_v32, 0.0  ;;  %2985 = vst [vmem:[#allocation8_spill] sm:$0xff] %v1822_v26 }
  0xf4   :  { %v685_v35 = vadd.f32 %v684_v34, %v683_v29  ;;  %v880_v39 = vadd.f32 %v879_v33, %v878_v28  ;;  %v1788_v41 = vpop.f32.mrf.mxu0 }
  0xf5   :  { %v686_v48 = vsel %vm652_vm2, %v1788_v41, 0.0  ;;  %v803_v49 = vmul.f32 %v1788_v41, %v1788_v41  ;;  %v887_v16 = vsel %vm652_vm2, %v805_v58, 0.0 }
  0xf6   :  { %v882_v52 = vadd.f32 %v881_v45, %v880_v39  ;;  %v687_v53 = vadd.f32 %v686_v48, %v685_v35  ;;  %v1799_v56 = vpop.f32.mrf.mxu0 }
  0xf7   :  { %v883_v60 = vsel %vm652_vm2, %v803_v49, 0.0  ;;  %v808_v27 = vmul.f32 %v1799_v56, %v1799_v56  ;;  %v696_v44 = vsel %vm652_vm2, %v1799_v56, 0.0 }
  0xf8   :  { %v689_v63 = vadd.f32 %v688_v57, %v687_v53  ;;  %v884_v0 = vadd.f32 %v883_v60, %v882_v52  ;;  %v1806_v1 = vpop.f32.mrf.mxu0  ;;  %v1840_v57 = vpop.f32.mrf.mxu1 }
  0xf9   :  { %v806_v9 = vmul.f32 %v1806_v1, %v1806_v1  ;;  %v692_v17 = vsel %vm652_vm2, %v1806_v1, 0.0  ;;  %2986 = vst [vmem:[#allocation9_spill] sm:$0xff] %v1840_v57  ;;  %v893_v58 = vsel %vm652_vm2, %v808_v27, 0.0 }
  0xfa   :  { %v886_v10 = vadd.f32 %v885_v7, %v884_v0  ;;  %v691_v13 = vadd.f32 %v690_v8, %v689_v63  ;;  %v1815_v15 = vpop.f32.mrf.mxu0 }
  0xfb   :  { %v889_v28 = vsel %vm652_vm2, %v806_v9, 0.0  ;;  %v809_v45 = vmul.f32 %v1815_v15, %v1815_v15  ;;  %v698_v60 = vsel %vm652_vm2, %v1815_v15, 0.0 }
  0xfc   :  { %v693_v20 = vadd.f32 %v692_v17, %v691_v13  ;;  %v888_v21 = vadd.f32 %v887_v16, %v886_v10  ;;  %v1820_v24 = vpop.f32.mrf.mxu0 }
  0xfd   :  { %v694_v29 = vsel %vm652_vm2, %v1820_v24, 0.0  ;;  %v807_v33 = vmul.f32 %v1820_v24, %v1820_v24  ;;  %v895_v9 = vsel %vm652_vm2, %v809_v45, 0.0 }
  0xfe   :  { %v890_v34 = vadd.f32 %v889_v28, %v888_v21  ;;  %v695_v35 = vadd.f32 %v694_v29, %v693_v20  ;;  %v1831_v39 = vpop.f32.mrf.mxu0  ;;  %v1854_v20 = vpop.f32.mrf.mxu1 }
  0xff   :  { %v891_v48 = vsel %vm652_vm2, %v807_v33, 0.0  ;;  %v812_v21 = vmul.f32 %v1831_v39, %v1831_v39 }
 0x100   :  { %v697_v49 = vadd.f32 %v696_v44, %v695_v35  ;;  %v892_v52 = vadd.f32 %v891_v48, %v890_v34  ;;  %v1838_v53 = vpop.f32.mrf.mxu0  ;;  %v704_v44 = vsel %vm652_vm2, %v1831_v39, 0.0 }
 0x101   :  { %v810_v63 = vmul.f32 %v1838_v53, %v1838_v53  ;;  %v700_v10 = vsel %vm652_vm2, %v1838_v53, 0.0 }
 0x102   :  { %v894_v0 = vadd.f32 %v893_v58, %v892_v52  ;;  %v699_v7 = vadd.f32 %v698_v60, %v697_v49  ;;  %v1847_v8 = vpop.f32.mrf.mxu0  ;;  %v1872_v60 = vpop.f32.mrf.mxu1 }
 0x103   :  { %v897_v27 = vsel %vm652_vm2, %v810_v63, 0.0  ;;  %v813_v45 = vmul.f32 %v1847_v8, %v1847_v8  ;;  %v901_v63 = vsel %vm652_vm2, %v812_v21, 0.0 }
 0x104   :  { %v701_v13 = vadd.f32 %v700_v10, %v699_v7  ;;  %v896_v16 = vadd.f32 %v895_v9, %v894_v0  ;;  %v1852_v17 = vpop.f32.mrf.mxu0  ;;  %v706_v0 = vsel %vm652_vm2, %v1847_v8, 0.0  ;;  %v1886_v21 = vpop.f32.mrf.mxu1 }
 0x105   :  { %v702_v28 = vsel %vm652_vm2, %v1852_v17, 0.0  ;;  %v811_v29 = vmul.f32 %v1852_v17, %v1852_v17  ;;  %2989 = vst [vmem:[#allocation12_spill] sm:$0xff] %v1886_v21 }
 0x106   :  { %v898_v33 = vadd.f32 %v897_v27, %v896_v16  ;;  %v703_v34 = vadd.f32 %v702_v28, %v701_v13  ;;  %v1863_v35 = vpop.f32.mrf.mxu0  ;;  %v903_v16 = vsel %vm652_vm2, %v813_v45, 0.0 }
 0x107   :  { %2987 = vst [vmem:[#allocation10_spill] sm:$0xff] %v1863_v35  ;;  %v899_v48 = vsel %vm652_vm2, %v811_v29, 0.0 }
 0x108   :  { %v705_v49 = vadd.f32 %v704_v44, %v703_v34  ;;  %v900_v52 = vadd.f32 %v899_v48, %v898_v33  ;;  %v1870_v58 = vpop.f32.mrf.mxu0  ;;  %v816_v34 = vmul.f32 %v1863_v35, %v1863_v35 }
 0x109   :  { %2988 = vst [vmem:[#allocation11_spill] sm:$0xff] %v1870_v58  ;;  %v814_v7 = vmul.f32 %v1870_v58, %v1870_v58  ;;  %v708_v27 = vsel %vm652_vm2, %v1870_v58, 0.0 }
 0x10a   :  { %v902_v9 = vadd.f32 %v901_v63, %v900_v52  ;;  %v707_v10 = vadd.f32 %v706_v0, %v705_v49  ;;  %v1879_v13 = vpop.f32.mrf.mxu0  ;;  %v712_v63 = vsel %vm652_vm2, %v1863_v35, 0.0  ;;  %v716_v35 = vsel %vm652_vm2, %v1676_v55, 0.0 }
 0x10b   :  { %v905_v44 = vsel %vm652_vm2, %v814_v7, 0.0  ;;  %v817_v0 = vmul.f32 %v1879_v13, %v1879_v13  ;;  %v909_v7 = vsel %vm652_vm2, %v816_v34, 0.0  ;;  %v714_v58 = vsel %vm652_vm2, %v1879_v13, 0.0 }
 0x10c   :  { %v709_v28 = vadd.f32 %v708_v27, %v707_v10  ;;  %v904_v29 = vadd.f32 %v903_v16, %v902_v9  ;;  %v1884_v33 = vpop.f32.mrf.mxu0  ;;  %v1900_v27 = vpop.f32.mrf.mxu1  ;;  %v820_v34 = vmul.f32 %v1666_v47, %v1666_v47 }
 0x10d   :  { %v710_v48 = vsel %vm652_vm2, %v1884_v33, 0.0  ;;  %v815_v45 = vmul.f32 %v1884_v33, %v1884_v33  ;;  %2990 = vst [vmem:[#allocation13_spill] sm:$0xff] %v1900_v27 }
 0x10e   :  { %v906_v49 = vadd.f32 %v905_v44, %v904_v29  ;;  %v711_v52 = vadd.f32 %v710_v48, %v709_v28  ;;  %v818_v28 = vmul.f32 %v1676_v55, %v1676_v55  ;;  %v911_v48 = vsel %vm652_vm2, %v817_v0, 0.0 }
 0x10f   :  { %v907_v9 = vsel %vm652_vm2, %v815_v45, 0.0  ;;  %v819_v45 = vmul.f32 %v1692_v4, %v1692_v4  ;;  %v917_v55 = vsel %vm652_vm2, %v820_v34, 0.0  ;;  %v824_v34 = vmul.f32 %v1703_v12, %v1703_v12 }
 0x110   :  { %v713_v10 = vadd.f32 %v712_v63, %v711_v52  ;;  %v908_v16 = vadd.f32 %v907_v9, %v906_v49  ;;  %v1912_v63 = vpop.f32.mrf.mxu1  ;;  %v913_v9 = vsel %vm652_vm2, %v818_v28, 0.0  ;;  %v722_v28 = vsel %vm652_vm2, %v1685_v62, 0.0 }
 0x112   :  { %v715_v29 = vadd.f32 %v714_v58, %v713_v10  ;;  %v910_v44 = vadd.f32 %v909_v7, %v908_v16  ;;  %v718_v58 = vsel %vm652_vm2, %v1692_v4, 0.0  ;;  %v720_v16 = vsel %vm652_vm2, %v1666_v47, 0.0 }
 0x113   :  { %v821_v7 = vmul.f32 %v1685_v62, %v1685_v62  ;;  %v724_v47 = vsel %vm652_vm2, %v1712_v19, 0.0 }
 0x114   :  { %v912_v49 = vadd.f32 %v911_v48, %v910_v44  ;;  %v717_v52 = vadd.f32 %v716_v35, %v715_v29  ;;  %v915_v35 = vsel %vm652_vm2, %v819_v45, 0.0  ;;  %v1924_v48 = vpop.f32.mrf.mxu1  ;;  %v823_v45 = vmul.f32 %v1744_v51, %v1744_v51 }
 0x116   :  { %v719_v10 = vadd.f32 %v718_v58, %v717_v52  ;;  %v914_v0 = vadd.f32 %v913_v9, %v912_v49  ;;  %v822_v49 = vmul.f32 %v1712_v19, %v1712_v19  ;;  %v919_v58 = vsel %vm652_vm2, %v821_v7, 0.0 }
 0x117   :  { %v925_v19 = vsel %vm652_vm2, %v824_v34, 0.0  ;;  %v828_v34 = vmul.f32 %v1758_v5, %v1758_v5 }
 0x118   :  { %v721_v29 = vadd.f32 %v720_v16, %v719_v10  ;;  %v916_v44 = vadd.f32 %v915_v35, %v914_v0  ;;  %v1936_v16 = vpop.f32.mrf.mxu1  ;;  %v921_v35 = vsel %vm652_vm2, %v822_v49, 0.0  ;;  %v730_v49 = vsel %vm652_vm2, %v1726_v31, 0.0 }
 0x119   :  { %2991 = vst [vmem:[#allocation14_spill] sm:$0xff] %v1936_v16 }
 0x11a   :  { %v918_v52 = vadd.f32 %v917_v55, %v916_v44  ;;  %v723_v9 = vadd.f32 %v722_v28, %v721_v29  ;;  %v726_v55 = vsel %vm652_vm2, %v1744_v51, 0.0  ;;  %v728_v44 = vsel %vm652_vm2, %v1703_v12, 0.0 }
 0x11b   :  { %v825_v28 = vmul.f32 %v1726_v31, %v1726_v31  ;;  %v732_v12 = vsel %vm652_vm2, %v1776_v23, 0.0 }
 0x11c   :  { %v725_v10 = vadd.f32 %v724_v47, %v723_v9  ;;  %v920_v0 = vadd.f32 %v919_v58, %v918_v52  ;;  %v923_v47 = vsel %vm652_vm2, %v823_v45, 0.0  ;;  %v1948_v58 = vpop.f32.mrf.mxu1  ;;  %v827_v45 = vmul.f32 %v1808_v6, %v1808_v6 }
 0x11d   :  { %2992 = vst [vmem:[#allocation15_spill] sm:$0xff] %v1948_v58 }
 0x11e   :  { %v922_v29 = vadd.f32 %v921_v35, %v920_v0  ;;  %v727_v7 = vadd.f32 %v726_v55, %v725_v10  ;;  %v826_v10 = vmul.f32 %v1776_v23, %v1776_v23  ;;  %v927_v55 = vsel %vm652_vm2, %v825_v28, 0.0 }
 0x11f   :  { %v933_v23 = vsel %vm652_vm2, %v828_v34, 0.0  ;;  %v832_v34 = vmul.f32 %v1822_v26, %v1822_v26 }
 0x120   :  { %v729_v52 = vadd.f32 %v728_v44, %v727_v7  ;;  %v924_v9 = vadd.f32 %v923_v47, %v922_v29  ;;  %v1960_v44 = vpop.f32.mrf.mxu1  ;;  %v929_v47 = vsel %vm652_vm2, %v826_v10, 0.0  ;;  %v738_v10 = vsel %vm652_vm2, %v1790_v43, 0.0 }
 0x121   :  { %2993 = vst [vmem:[#allocation16_spill] sm:$0xff] %v1960_v44 }
 0x122   :  { %v926_v0 = vadd.f32 %v925_v19, %v924_v9  ;;  %v731_v35 = vadd.f32 %v730_v49, %v729_v52  ;;  %v734_v19 = vsel %vm652_vm2, %v1808_v6, 0.0  ;;  %v736_v9 = vsel %vm652_vm2, %v1758_v5, 0.0 }
 0x123   :  { %v829_v49 = vmul.f32 %v1790_v43, %v1790_v43  ;;  %v740_v5 = vsel %vm652_vm2, %v1840_v57, 0.0 }
 0x124   :  { %v733_v29 = vadd.f32 %v732_v12, %v731_v35  ;;  %v928_v7 = vadd.f32 %v927_v55, %v926_v0  ;;  %v931_v12 = vsel %vm652_vm2, %v827_v45, 0.0  ;;  %v1972_v55 = vpop.f32.mrf.mxu1  ;;  %v831_v45 = vmul.f32 %v1872_v60, %v1872_v60 }
 0x125   :  { %2994 = vst [vmem:[#allocation17_spill] sm:$0xff] %v1972_v55 }
 0x126   :  { %v930_v52 = vadd.f32 %v929_v47, %v928_v7  ;;  %v735_v28 = vadd.f32 %v734_v19, %v733_v29  ;;  %v830_v29 = vmul.f32 %v1840_v57, %v1840_v57  ;;  %v935_v19 = vsel %vm652_vm2, %v829_v49, 0.0 }
 0x127   :  { %v941_v57 = vsel %vm652_vm2, %v832_v34, 0.0  ;;  %v836_v34 = vmul.f32 %v1886_v21, %v1886_v21 }
 0x128   :  { %v737_v0 = vadd.f32 %v736_v9, %v735_v28  ;;  %v932_v35 = vadd.f32 %v931_v12, %v930_v52  ;;  %v1984_v9 = vpop.f32.mrf.mxu1  ;;  %v937_v12 = vsel %vm652_vm2, %v830_v29, 0.0  ;;  %v746_v29 = vsel %vm652_vm2, %v1854_v20, 0.0 }
 0x129   :  { %2995 = vst [vmem:[#allocation18_spill] sm:$0xff] %v1984_v9 }
 0x12a   :  { %v934_v7 = vadd.f32 %v933_v23, %v932_v35  ;;  %v739_v47 = vadd.f32 %v738_v10, %v737_v0  ;;  %v742_v23 = vsel %vm652_vm2, %v1872_v60, 0.0  ;;  %v744_v35 = vsel %vm652_vm2, %v1822_v26, 0.0 }
 0x12b   :  { %v833_v10 = vmul.f32 %v1854_v20, %v1854_v20  ;;  %v748_v26 = vsel %vm652_vm2, %v1900_v27, 0.0 }
 0x12c   :  { %v741_v52 = vadd.f32 %v740_v5, %v739_v47  ;;  %v936_v28 = vadd.f32 %v935_v19, %v934_v7  ;;  %v939_v5 = vsel %vm652_vm2, %v831_v45, 0.0  ;;  %v1996_v19 = vpop.f32.mrf.mxu1  ;;  %v835_v45 = vmul.f32 %v1924_v48, %v1924_v48 }
 0x12d   :  { %2996 = vst [vmem:[#allocation19_spill] sm:$0xff] %v1996_v19 }
 0x12e   :  { %v938_v0 = vadd.f32 %v937_v12, %v936_v28  ;;  %v743_v49 = vadd.f32 %v742_v23, %v741_v52  ;;  %v834_v52 = vmul.f32 %v1900_v27, %v1900_v27  ;;  %v943_v23 = vsel %vm652_vm2, %v833_v10, 0.0 }
 0x12f   :  { %v949_v27 = vsel %vm652_vm2, %v836_v34, 0.0  ;;  %v840_v34 = vmul.f32 %v1936_v16, %v1936_v16 }
 0x130   :  { %v745_v7 = vadd.f32 %v744_v35, %v743_v49  ;;  %v940_v47 = vadd.f32 %v939_v5, %v938_v0  ;;  %v2008_v35 = vpop.f32.mrf.mxu1  ;;  %v945_v5 = vsel %vm652_vm2, %v834_v52, 0.0  ;;  %v754_v52 = vsel %vm652_vm2, %v1912_v63, 0.0 }
 0x131   :  { %2997 = vst [vmem:[#allocation20_spill] sm:$0xff] %v2008_v35 }
 0x132   :  { %v942_v28 = vadd.f32 %v941_v57, %v940_v47  ;;  %v747_v12 = vadd.f32 %v746_v29, %v745_v7  ;;  %v750_v57 = vsel %vm652_vm2, %v1924_v48, 0.0  ;;  %v752_v47 = vsel %vm652_vm2, %v1886_v21, 0.0 }
 0x133   :  { %v837_v29 = vmul.f32 %v1912_v63, %v1912_v63  ;;  %v756_v21 = vsel %vm652_vm2, %v1948_v58, 0.0 }
 0x134   :  { %v749_v0 = vadd.f32 %v748_v26, %v747_v12  ;;  %v944_v49 = vadd.f32 %v943_v23, %v942_v28  ;;  %v947_v26 = vsel %vm652_vm2, %v835_v45, 0.0  ;;  %v2020_v23 = vpop.f32.mrf.mxu1  ;;  %v839_v45 = vmul.f32 %v1972_v55, %v1972_v55 }
 0x135   :  { %2998 = vst [vmem:[#allocation21_spill] sm:$0xff] %v2020_v23 }
 0x136   :  { %v946_v7 = vadd.f32 %v945_v5, %v944_v49  ;;  %v751_v10 = vadd.f32 %v750_v57, %v749_v0  ;;  %v838_v0 = vmul.f32 %v1948_v58, %v1948_v58  ;;  %v951_v57 = vsel %vm652_vm2, %v837_v29, 0.0 }
 0x137   :  { %v957_v58 = vsel %vm652_vm2, %v840_v34, 0.0  ;;  %v844_v34 = vmul.f32 %v1984_v9, %v1984_v9 }
 0x138   :  { %v753_v28 = vadd.f32 %v752_v47, %v751_v10  ;;  %v948_v12 = vadd.f32 %v947_v26, %v946_v7  ;;  %v2032_v47 = vpop.f32.mrf.mxu1  ;;  %v953_v26 = vsel %vm652_vm2, %v838_v0, 0.0  ;;  %v762_v0 = vsel %vm652_vm2, %v1960_v44, 0.0 }
 0x139   :  { %2999 = vst [vmem:[#allocation22_spill] sm:$0xff] %v2032_v47 }
 0x13a   :  { %v950_v49 = vadd.f32 %v949_v27, %v948_v12  ;;  %v755_v5 = vadd.f32 %v754_v52, %v753_v28  ;;  %v758_v27 = vsel %vm652_vm2, %v1972_v55, 0.0  ;;  %v760_v12 = vsel %vm652_vm2, %v1936_v16, 0.0 }
 0x13b   :  { %v841_v52 = vmul.f32 %v1960_v44, %v1960_v44  ;;  %v764_v16 = vsel %vm652_vm2, %v1996_v19, 0.0 }
 0x13c   :  { %v757_v7 = vadd.f32 %v756_v21, %v755_v5  ;;  %v952_v10 = vadd.f32 %v951_v57, %v950_v49  ;;  %v955_v21 = vsel %vm652_vm2, %v839_v45, 0.0  ;;  %v2044_v57 = vpop.f32.mrf.mxu1  ;;  %v843_v45 = vmul.f32 %v2020_v23, %v2020_v23 }
 0x13d   :  { %3000 = vst [vmem:[#allocation23_spill] sm:$0xff] %v2044_v57 }
 0x13e   :  { %v954_v28 = vadd.f32 %v953_v26, %v952_v10  ;;  %v759_v29 = vadd.f32 %v758_v27, %v757_v7  ;;  %v842_v7 = vmul.f32 %v1996_v19, %v1996_v19  ;;  %v959_v27 = vsel %vm652_vm2, %v841_v52, 0.0 }
 0x13f   :  { %v965_v19 = vsel %vm652_vm2, %v844_v34, 0.0  ;;  %v848_v34 = vmul.f32 %v2032_v47, %v2032_v47 }
 0x140   :  { %v761_v49 = vadd.f32 %v760_v12, %v759_v29  ;;  %v956_v5 = vadd.f32 %v955_v21, %v954_v28  ;;  %v2056_v12 = vpop.f32.mrf.mxu1  ;;  %v961_v21 = vsel %vm652_vm2, %v842_v7, 0.0  ;;  %v770_v7 = vsel %vm652_vm2, %v2008_v35, 0.0 }
 0x141   :  { %3001 = vst [vmem:[#allocation24_spill] sm:$0xff] %v2056_v12 }
 0x142   :  { %v958_v10 = vadd.f32 %v957_v58, %v956_v5  ;;  %v763_v26 = vadd.f32 %v762_v0, %v761_v49  ;;  %v766_v58 = vsel %vm652_vm2, %v2020_v23, 0.0  ;;  %v768_v5 = vsel %vm652_vm2, %v1984_v9, 0.0 }
 0x143   :  { %v845_v0 = vmul.f32 %v2008_v35, %v2008_v35  ;;  %v772_v9 = vsel %vm652_vm2, %v2044_v57, 0.0 }
 0x144   :  { %v765_v28 = vadd.f32 %v764_v16, %v763_v26  ;;  %v960_v29 = vadd.f32 %v959_v27, %v958_v10  ;;  %v963_v16 = vsel %vm652_vm2, %v843_v45, 0.0  ;;  %v2068_v27 = vpop.f32.mrf.mxu1 }
 0x145   :  { %3002 = vst [vmem:[#allocation25_spill] sm:$0xff] %v2068_v27  ;;  %v847_v45 = vmul.f32 %v2068_v27, %v2068_v27 }
 0x146   :  { %v962_v49 = vadd.f32 %v961_v21, %v960_v29  ;;  %v767_v52 = vadd.f32 %v766_v58, %v765_v28  ;;  %v846_v28 = vmul.f32 %v2044_v57, %v2044_v57  ;;  %v967_v58 = vsel %vm652_vm2, %v845_v0, 0.0 }
 0x147   :  { %v776_v0 = vsel %vm652_vm2, %v2032_v47, 0.0 }
 0x148   :  { %v769_v10 = vadd.f32 %v768_v5, %v767_v52  ;;  %v964_v26 = vadd.f32 %v963_v16, %v962_v49  ;;  %v969_v5 = vsel %vm652_vm2, %v846_v28, 0.0  ;;  %v774_v16 = vsel %vm652_vm2, %v2068_v27, 0.0 }
 0x149   :  { %v778_v28 = vsel %vm652_vm2, %v2056_v12, 0.0 }
 0x14a   :  { %v966_v29 = vadd.f32 %v965_v19, %v964_v26  ;;  %v771_v21 = vadd.f32 %v770_v7, %v769_v10  ;;  %v849_v26 = vmul.f32 %v2056_v12, %v2056_v12  ;;  %v971_v7 = vsel %vm652_vm2, %v847_v45, 0.0 }
 0x14c   :  { %v773_v49 = vadd.f32 %v772_v9, %v771_v21  ;;  %v968_v52 = vadd.f32 %v967_v58, %v966_v29  ;;  %v973_v21 = vsel %vm652_vm2, %v848_v34, 0.0 }
 0x14e   :  { %v970_v19 = vadd.f32 %v969_v5, %v968_v52  ;;  %v775_v10 = vadd.f32 %v774_v16, %v773_v49  ;;  %v975_v52 = vsel %vm652_vm2, %v849_v26, 0.0  ;;  %v996_v26 = vlaneseq }
 0x150   :  { %v777_v9 = vadd.f32 %v776_v0, %v775_v10  ;;  %v972_v29 = vadd.f32 %v971_v7, %v970_v19 }
 0x152   :  { %v779_v58 = vadd.f32 %v778_v28, %v777_v9  ;;  %v974_v57 = vadd.f32 %v973_v21, %v972_v29 }
 0x154   :  { %v780_v49 = vrot.slane %v779_v58, 4  ;;  %v976_v5 = vadd.f32 %v975_v52, %v974_v57  ;;  %v2094_v57 = vshrl.u32 %v996_v26, 7 }
 0x156   :  { %v781_v16 = vadd.f32 %v780_v49, %v779_v58  ;;  %v977_v47 = vrot.slane %v976_v5, 4 }
 0x158   :  { %v782_v27 = vrot.slane %v781_v16, 2  ;;  %v978_v35 = vadd.f32 %v977_v47, %v976_v5  ;;  %v988_v47 = vld [vmem:[%s2951_s2] sm:$0x1] }
 0x15a   :  { %v783_v23 = vadd.f32 %v782_v27, %v781_v16  ;;  %v979_v44 = vrot.slane %v978_v35, 2  ;;  %v2978_v27 = vsub.s32 0, %v2094_v57 }
 0x15c   :  { %v784_v45 = vrot.slane %v783_v23, 1  ;;  %v980_v10 = vadd.f32 %v979_v44, %v978_v35 }
 0x15e   :  { %v785_v19 = vadd.f32 %v784_v45, %v783_v23  ;;  %v981_v0 = vrot.slane %v980_v10, 1  ;;  %v2103_v23 = vld [vmem:[%s2952_s3] sm:$0x1]  ;;  %v3003_v45 = vld [vmem:[#allocation11_spill] sm:$0xff] }
 0x160   :  { %v982_v34 = vadd.f32 %v981_v0, %v980_v10  ;;  %v983_v7 = vmul.f32 0.001953125, %v785_v19  ;;  %v3004_v10 = vld [vmem:[#allocation10_spill] sm:$0xff]  ;;  %v3005_v19 = vld [vmem:[#allocation3_spill] sm:$0xff] }
 0x162   :  { %v984_v55 = vmul.f32 0.001953125, %v982_v34  ;;  %v985_v12 = vmul.f32 %v983_v7, %v983_v7  ;;  %v3006_v34 = vld [vmem:[#allocation2_spill] sm:$0xff] }
 0x164   :  { %v986_v9 = vsub.f32 %v984_v55, %v985_v12 }
 0x166   :  { %v987_v29 = vmax.f32 %v986_v9, 0.0  ;;  %v3007_v9 = vld [vmem:[#allocation5_spill] sm:$0xff] }
 0x168   :  { %v989_v21 = vadd.f32 1e-05, %v987_v29 }
 0x16a   :  { %1482 = vrsqrt.f32 %v989_v21  ;;  %v3008_v21 = vld [vmem:[#allocation4_spill] sm:$0xff] }
 0x177   :  { %v1483_v44 = vpop.eup %1482 }
 0x178   :  { %v991_v35 = vmul.f32 %v1483_v44, %v988_v47  ;;  %v3009_v47 = vld [vmem:[#allocation7_spill] sm:$0xff] }
 0x17a   :  { %v2105_v55 = vmul.f32 %v991_v35, %v983_v7  ;;  %v2109_v12 = vrot.slane %v991_v35, %v2978_v27  ;;  %v3010_v35 = vld [vmem:[#allocation6_spill] sm:$0xff]  ;;  %v3023_v27 = vld [vmem:[#allocation16_spill] sm:$0xff] }
 0x17c   :  { %v994_v28 = vsub.f32 %v2103_v23, %v2105_v55  ;;  %v2115_v58 = vmul.f32 %v2109_v12, %v1648_v37  ;;  %v2119_v52 = vmul.f32 %v2109_v12, %v1654_v40  ;;  %v2123_v49 = vmul.f32 %v1646_v36, %v2109_v12  ;;  %v3011_v55 = vld [vmem:[#allocation9_spill] sm:$0xff] }
 0x17d   :  { %v2127_v5 = vmul.f32 %v1650_v38, %v2109_v12  ;;  %v2131_v16 = vmul.f32 %v2109_v12, %v1674_v54  ;;  %v2135_v37 = vmul.f32 %v2109_v12, %v1690_v3  ;;  %v2139_v40 = vmul.f32 %v1664_v46, %v2109_v12 }
 0x17e   :  { %v2143_v36 = vmul.f32 %v1683_v61, %v2109_v12  ;;  %v2147_v38 = vmul.f32 %v2109_v12, %v1710_v18  ;;  %v2151_v54 = vmul.f32 %v2109_v12, %v1724_v30  ;;  %v2155_v3 = vmul.f32 %v1701_v11, %v2109_v12 }
 0x17f   :  { %v2159_v46 = vmul.f32 %v1719_v25, %v2109_v12  ;;  %v2163_v61 = vmul.f32 %v2109_v12, %v1742_v50  ;;  %v2167_v18 = vmul.f32 %v2109_v12, %v1756_v2  ;;  %v2171_v30 = vmul.f32 %v1735_v42, %v2109_v12 }
 0x180   :  { %v2175_v11 = vmul.f32 %v1751_v59, %v2109_v12  ;;  %v2179_v25 = vmul.f32 %v2109_v12, %v1774_v22  ;;  %v2183_v50 = vmul.f32 %v2109_v12, %v1788_v41  ;;  %v2187_v2 = vmul.f32 %v1767_v14, %v2109_v12 }
 0x181   :  { %v2191_v42 = vmul.f32 %v1783_v32, %v2109_v12  ;;  %v2195_v59 = vmul.f32 %v2109_v12, %v1806_v1  ;;  %v2199_v22 = vmul.f32 %v2109_v12, %v1820_v24  ;;  %v2203_v41 = vmul.f32 %v1799_v56, %v2109_v12 }
 0x182   :  { %v2207_v14 = vmul.f32 %v1815_v15, %v2109_v12  ;;  %v2211_v32 = vmul.f32 %v2109_v12, %v1838_v53  ;;  %v2215_v1 = vmul.f32 %v2109_v12, %v1852_v17  ;;  %v2219_v24 = vmul.f32 %v1831_v39, %v2109_v12 }
 0x183   :  { %v2223_v56 = vmul.f32 %v1847_v8, %v2109_v12  ;;  %v2227_v15 = vmul.f32 %v2109_v12, %v3003_v45  ;;  %v2231_v53 = vmul.f32 %v2109_v12, %v1884_v33  ;;  %v2235_v17 = vmul.f32 %v3004_v10, %v2109_v12  ;;  %v3012_v10 = vld [vmem:[#allocation8_spill] sm:$0xff] }
 0x184   :  { %v2239_v39 = vmul.f32 %v1879_v13, %v2109_v12  ;;  %v2243_v8 = vmul.f32 %v2109_v12, %v3005_v19  ;;  %v2247_v0 = vmul.f32 %v2109_v12, %v1692_v4  ;;  %v2251_v33 = vmul.f32 %v3006_v34, %v2109_v12  ;;  %v3013_v34 = vld [vmem:[#allocation13_spill] sm:$0xff] }
 0x185   :  { %v2255_v7 = vmul.f32 %v1685_v62, %v2109_v12  ;;  %v2259_v13 = vmul.f32 %v2109_v12, %v3007_v9  ;;  %v2263_v29 = vmul.f32 %v2109_v12, %v1744_v51  ;;  %v2267_v4 = vmul.f32 %v3008_v21, %v2109_v12  ;;  %v3014_v21 = vld [vmem:[#allocation12_spill] sm:$0xff] }
 0x186   :  { %v2271_v26 = vmul.f32 %v1726_v31, %v2109_v12  ;;  %v2275_v62 = vmul.f32 %v2109_v12, %v3009_v47  ;;  %v2279_v44 = vmul.f32 %v2109_v12, %v1808_v6  ;;  %v2283_v51 = vmul.f32 %v3010_v35, %v2109_v12  ;;  %v3017_v35 = vld [vmem:[#allocation15_spill] sm:$0xff] }
 0x187   :  { %v2287_v23 = vmul.f32 %v1790_v43, %v2109_v12  ;;  %v2291_v31 = vmul.f32 %v2109_v12, %v3011_v55  ;;  %v2295_v45 = vmul.f32 %v2109_v12, %v1872_v60  ;;  %v2299_v6 = vmul.f32 %v3012_v10, %v2109_v12  ;;  %v3019_v55 = vld [vmem:[#allocation17_spill] sm:$0xff] }
 0x188   :  { %v2303_v19 = vmul.f32 %v1854_v20, %v2109_v12  ;;  %v2307_v43 = vmul.f32 %v2109_v12, %v3013_v34  ;;  %v2311_v9 = vmul.f32 %v2109_v12, %v1924_v48  ;;  %v2315_v60 = vmul.f32 %v3014_v21, %v2109_v12  ;;  %v3021_v34 = vld [vmem:[#allocation14_spill] sm:$0xff] }
 0x189   :  { %v2319_v47 = vmul.f32 %v1912_v63, %v2109_v12  ;;  %v2323_v20 = vmul.f32 %v2109_v12, %v3017_v35  ;;  %v2327_v10 = vmul.f32 %v2109_v12, %v3019_v55  ;;  %v2331_v48 = vmul.f32 %v3021_v34, %v2109_v12 }
 0x18a   :  { %3015 = vst [vmem:[#allocation11_spill] sm:$0xff] %v2315_v60  ;;  %v2335_v21 = vmul.f32 %v3023_v27, %v2109_v12  ;;  %v3025_v60 = vld [vmem:[#allocation19_spill] sm:$0xff] }
 0x18b   :  { %3016 = vst [vmem:[#allocation10_spill] sm:$0xff] %v2319_v47  ;;  %3018 = vst [vmem:[#allocation3_spill] sm:$0xff] %v2323_v20  ;;  %v2339_v63 = vmul.f32 %v2109_v12, %v3025_v60  ;;  %v3027_v47 = vld [vmem:[#allocation21_spill] sm:$0xff]  ;;  %v3029_v20 = vld [vmem:[#allocation18_spill] sm:$0xff] }
 0x18c   :  { %3020 = vst [vmem:[#allocation2_spill] sm:$0xff] %v2327_v10  ;;  %3022 = vst [vmem:[#allocation5_spill] sm:$0xff] %v2331_v48  ;;  %v2343_v35 = vmul.f32 %v2109_v12, %v3027_v47  ;;  %v2347_v55 = vmul.f32 %v3029_v20, %v2109_v12  ;;  %v3031_v10 = vld [vmem:[#allocation20_spill] sm:$0xff]  ;;  %v3032_v48 = vsub.s32 0, %v2094_v57 }
 0x18d   :  { %3024 = vst [vmem:[#allocation4_spill] sm:$0xff] %v2335_v21  ;;  %3026 = vst [vmem:[#allocation7_spill] sm:$0xff] %v2339_v63  ;;  %v2351_v34 = vmul.f32 %v3031_v10, %v2109_v12  ;;  %v3033_v21 = vld [vmem:[#allocation23_spill] sm:$0xff]  ;;  %v3034_v63 = vld [vmem:[#allocation25_spill] sm:$0xff] }
 0x18e   :  { %3028 = vst [vmem:[#allocation6_spill] sm:$0xff] %v2343_v35  ;;  %3030 = vst [vmem:[#allocation9_spill] sm:$0xff] %v2347_v55  ;;  %v2355_v27 = vrot.slane %v994_v28, %v3032_v48  ;;  %v2359_v60 = vmul.f32 %v2109_v12, %v3033_v21  ;;  %v2363_v47 = vmul.f32 %v2109_v12, %v3034_v63  ;;  %v3035_v35 = vld [vmem:[#allocation22_spill] sm:$0xff]  ;;  %v3036_v55 = vld [vmem:[#allocation24_spill] sm:$0xff] }
 0x18f   :  { %v2367_v20 = vmul.f32 %v3035_v35, %v2109_v12  ;;  %v2371_v10 = vmul.f32 %v3036_v55, %v2109_v12 }
 0x190   :  { %v2375_v57 = vadd.f32 %v2355_v27, %v2115_v58  ;;  %v2379_v28 = vadd.f32 %v2355_v27, %v2119_v52  ;;  %v2383_v48 = vadd.f32 %v2355_v27, %v2123_v49  ;;  %v2387_v21 = vadd.f32 %v2355_v27, %v2127_v5 }
 0x191   :  { %v2391_v12 = vadd.f32 %v2355_v27, %v2131_v16  ;;  %v2395_v58 = vadd.f32 %v2355_v27, %v2135_v37  ;;  %v2399_v52 = vadd.f32 %v2355_v27, %v2139_v40  ;;  %v2403_v49 = vadd.f32 %v2355_v27, %v2143_v36  ;;  %v3040_v63 = vld [vmem:[#allocation11_spill] sm:$0xff] }
 0x192   :  { %v2407_v5 = vadd.f32 %v2355_v27, %v2147_v38  ;;  %v2411_v16 = vadd.f32 %v2355_v27, %v2151_v54  ;;  %v2415_v37 = vadd.f32 %v2355_v27, %v2155_v3  ;;  %v2419_v40 = vadd.f32 %v2355_v27, %v2159_v46  ;;  %v3042_v35 = vld [vmem:[#allocation10_spill] sm:$0xff]  ;;  %v3044_v55 = vld [vmem:[#allocation3_spill] sm:$0xff] }
 0x193   :  { %v2423_v36 = vadd.f32 %v2355_v27, %v2163_v61  ;;  %v2427_v38 = vadd.f32 %v2355_v27, %v2167_v18  ;;  %v2431_v54 = vadd.f32 %v2355_v27, %v2171_v30  ;;  %v2435_v3 = vadd.f32 %v2355_v27, %v2175_v11 }
 0x194   :  { %v2439_v46 = vadd.f32 %v2355_v27, %v2179_v25  ;;  %v2443_v61 = vadd.f32 %v2355_v27, %v2183_v50  ;;  %v2447_v18 = vadd.f32 %v2355_v27, %v2187_v2  ;;  %v2451_v30 = vadd.f32 %v2355_v27, %v2191_v42 }
 0x195   :  { %v2455_v11 = vadd.f32 %v2355_v27, %v2195_v59  ;;  %v2459_v25 = vadd.f32 %v2355_v27, %v2199_v22  ;;  %v2463_v50 = vadd.f32 %v2355_v27, %v2203_v41  ;;  %v2467_v2 = vadd.f32 %v2355_v27, %v2207_v14 }
 0x196   :  { %v2471_v42 = vadd.f32 %v2355_v27, %v2211_v32  ;;  %v2475_v59 = vadd.f32 %v2355_v27, %v2215_v1  ;;  %v2479_v22 = vadd.f32 %v2355_v27, %v2219_v24  ;;  %v2483_v41 = vadd.f32 %v2355_v27, %v2223_v56 }
 0x197   :  { %v2487_v14 = vadd.f32 %v2355_v27, %v2227_v15  ;;  %v2491_v32 = vadd.f32 %v2355_v27, %v2231_v53  ;;  %v2495_v1 = vadd.f32 %v2355_v27, %v2235_v17  ;;  %v2499_v24 = vadd.f32 %v2355_v27, %v2239_v39 }
 0x198   :  { %v2503_v56 = vadd.f32 %v2355_v27, %v2243_v8  ;;  %v2507_v15 = vadd.f32 %v2355_v27, %v2247_v0  ;;  %v2511_v53 = vadd.f32 %v2355_v27, %v2251_v33  ;;  %v2515_v17 = vadd.f32 %v2355_v27, %v2255_v7 }
 0x199   :  { %v2519_v39 = vadd.f32 %v2355_v27, %v2259_v13  ;;  %v2523_v8 = vadd.f32 %v2355_v27, %v2263_v29  ;;  %v2527_v0 = vadd.f32 %v2355_v27, %v2267_v4  ;;  %v2531_v33 = vadd.f32 %v2355_v27, %v2271_v26 }
 0x19a   :  { %v2535_v7 = vadd.f32 %v2355_v27, %v2275_v62  ;;  %v2539_v13 = vadd.f32 %v2355_v27, %v2279_v44  ;;  %v2543_v29 = vadd.f32 %v2355_v27, %v2283_v51  ;;  %v2547_v4 = vadd.f32 %v2355_v27, %v2287_v23 }
 0x19b   :  { %v2551_v26 = vadd.f32 %v2355_v27, %v2291_v31  ;;  %v2555_v62 = vadd.f32 %v2355_v27, %v2295_v45  ;;  %v2559_v44 = vadd.f32 %v2355_v27, %v2299_v6  ;;  %v2563_v51 = vadd.f32 %v2355_v27, %v2303_v19 }
 0x19c   :  { %v2567_v23 = vadd.f32 %v2355_v27, %v2307_v43  ;;  %v2571_v31 = vadd.f32 %v2355_v27, %v2311_v9  ;;  %v2575_v45 = vadd.f32 %v2355_v27, %v3040_v63  ;;  %v2579_v6 = vadd.f32 %v2355_v27, %v3042_v35 }
 0x19d   :  { %3037 = vst [vmem:[#allocation8_spill] sm:$0xff] %v2563_v51  ;;  %v2583_v19 = vadd.f32 %v2355_v27, %v3044_v55  ;;  %v3046_v51 = vld [vmem:[#allocation2_spill] sm:$0xff] }
 0x19e   :  { %3038 = vst [vmem:[#allocation13_spill] sm:$0xff] %v2567_v23  ;;  %3039 = vst [vmem:[#allocation12_spill] sm:$0xff] %v2571_v31  ;;  %v2587_v43 = vadd.f32 %v2355_v27, %v3046_v51  ;;  %v3047_v23 = vld [vmem:[#allocation5_spill] sm:$0xff]  ;;  %v3048_v31 = vld [vmem:[#allocation4_spill] sm:$0xff] }
 0x19f   :  { %3041 = vst [vmem:[#allocation15_spill] sm:$0xff] %v2575_v45  ;;  %3043 = vst [vmem:[#allocation17_spill] sm:$0xff] %v2579_v6  ;;  %v2591_v9 = vadd.f32 %v2355_v27, %v3047_v23  ;;  %v2595_v63 = vadd.f32 %v2355_v27, %v3048_v31  ;;  %v3049_v45 = vld [vmem:[#allocation7_spill] sm:$0xff]  ;;  %v3050_v6 = vld [vmem:[#allocation6_spill] sm:$0xff]  ;;  %v2611_v23 = vadd.f32 %v2355_v27, %v2351_v34  ;;  %v1136_v34 = vmax.f32 %v2379_v28, 0.0 }
 0x1a0   :  { %3045 = vst [vmem:[#allocation14_spill] sm:$0xff] %v2583_v19  ;;  %v2599_v35 = vadd.f32 %v2355_v27, %v3049_v45  ;;  %v2603_v55 = vadd.f32 %v2355_v27, %v3050_v6  ;;  %v3051_v19 = vld [vmem:[#allocation9_spill] sm:$0xff]  ;;  %v2615_v31 = vadd.f32 %v2355_v27, %v2359_v60  ;;  %v2619_v45 = vadd.f32 %v2355_v27, %v2363_v47 }
 0x1a1   :  { %v2607_v51 = vadd.f32 %v2355_v27, %v3051_v19  ;;  %3053 = vst [vmem:[#allocation19_spill] sm:$0xff] %v2611_v23  ;;  %v2623_v6 = vadd.f32 %v2355_v27, %v2367_v20  ;;  %v2627_v19 = vadd.f32 %v2355_v27, %v2371_v10  ;;  %v1137_v23 = vmax.f32 %v2383_v48, 0.0  ;;  %1200 = vst.msk [vmem:[%s2953_s4 + $0x8] sm:$0xff] %vm652_vm2, %v1136_v34 }
 0x1a2   :  { %3054 = vst [vmem:[#allocation21_spill] sm:$0xff] %v2615_v31  ;;  %3055 = vst [vmem:[#allocation18_spill] sm:$0xff] %v2619_v45  ;;  %v1138_v60 = vmax.f32 %v2387_v21, 0.0  ;;  %v1139_v31 = vmax.f32 %v2391_v12, 0.0  ;;  %v1140_v47 = vmax.f32 %v2395_v58, 0.0  ;;  %v1141_v45 = vmax.f32 %v2399_v52, 0.0 }
 0x1a3   :  { %3052 = vst [vmem:[#allocation16_spill] sm:$0xff] %v2607_v51  ;;  %3056 = vst [vmem:[#allocation20_spill] sm:$0xff] %v2623_v6  ;;  %v1135_v51 = vmax.f32 %v2375_v57, 0.0  ;;  %v1142_v20 = vmax.f32 %v2403_v49, 0.0  ;;  %v1143_v6 = vmax.f32 %v2407_v5, 0.0  ;;  %v1144_v27 = vmax.f32 %v2411_v16, 0.0 }
 0x1a4   :  { %v1145_v10 = vmax.f32 %v2415_v37, 0.0  ;;  %v1146_v57 = vmax.f32 %v2419_v40, 0.0  ;;  %1201 = vst.msk [vmem:[%s2953_s4 + $0x10] sm:$0xff] %vm652_vm2, %v1137_v23  ;;  %1202 = vst.msk [vmem:[%s2953_s4 + $0x18] sm:$0xff] %vm652_vm2, %v1138_v60  ;;  %v1147_v28 = vmax.f32 %v2423_v36, 0.0  ;;  %v1148_v48 = vmax.f32 %v2427_v38, 0.0 }
 0x1a5   :  { %1199 = vst.msk [vmem:[%s2953_s4] sm:$0xff] %vm652_vm2, %v1135_v51  ;;  %v1149_v21 = vmax.f32 %v2431_v54, 0.0  ;;  %v1150_v12 = vmax.f32 %v2435_v3, 0.0  ;;  %1203 = vst.msk [vmem:[%s2953_s4 + $0x20] sm:$0xff] %vm652_vm2, %v1139_v31  ;;  %v1151_v58 = vmax.f32 %v2439_v46, 0.0  ;;  %v1152_v52 = vmax.f32 %v2443_v61, 0.0 }
 0x1a6   :  { %1204 = vst.msk [vmem:[%s2953_s4 + $0x28] sm:$0xff] %vm652_vm2, %v1140_v47  ;;  %1205 = vst.msk [vmem:[%s2953_s4 + $0x30] sm:$0xff] %vm652_vm2, %v1141_v45  ;;  %v1153_v49 = vmax.f32 %v2447_v18, 0.0  ;;  %v1154_v5 = vmax.f32 %v2451_v30, 0.0  ;;  %v1155_v16 = vmax.f32 %v2455_v11, 0.0  ;;  %v1156_v37 = vmax.f32 %v2459_v25, 0.0 }
 0x1a7   :  { %1206 = vst.msk [vmem:[%s2953_s4 + $0x38] sm:$0xff] %vm652_vm2, %v1142_v20  ;;  %1207 = vst.msk [vmem:[%s2953_s4 + $0x40] sm:$0xff] %vm652_vm2, %v1143_v6  ;;  %v1157_v40 = vmax.f32 %v2463_v50, 0.0  ;;  %v1158_v36 = vmax.f32 %v2467_v2, 0.0  ;;  %v1159_v38 = vmax.f32 %v2471_v42, 0.0  ;;  %v1160_v54 = vmax.f32 %v2475_v59, 0.0 }
 0x1a8   :  { %1208 = vst.msk [vmem:[%s2953_s4 + $0x48] sm:$0xff] %vm652_vm2, %v1144_v27  ;;  %1209 = vst.msk [vmem:[%s2953_s4 + $0x50] sm:$0xff] %vm652_vm2, %v1145_v10  ;;  %v1161_v3 = vmax.f32 %v2479_v22, 0.0  ;;  %v1162_v46 = vmax.f32 %v2483_v41, 0.0  ;;  %v1163_v61 = vmax.f32 %v2487_v14, 0.0  ;;  %v1164_v18 = vmax.f32 %v2491_v32, 0.0 }
 0x1a9   :  { %1210 = vst.msk [vmem:[%s2953_s4 + $0x58] sm:$0xff] %vm652_vm2, %v1146_v57  ;;  %1211 = vst.msk [vmem:[%s2953_s4 + $0x60] sm:$0xff] %vm652_vm2, %v1147_v28  ;;  %v1165_v30 = vmax.f32 %v2495_v1, 0.0  ;;  %v1166_v11 = vmax.f32 %v2499_v24, 0.0  ;;  %v1167_v25 = vmax.f32 %v2503_v56, 0.0  ;;  %v1168_v50 = vmax.f32 %v2507_v15, 0.0 }
 0x1aa   :  { %1212 = vst.msk [vmem:[%s2953_s4 + $0x68] sm:$0xff] %vm652_vm2, %v1148_v48  ;;  %1213 = vst.msk [vmem:[%s2953_s4 + $0x70] sm:$0xff] %vm652_vm2, %v1149_v21  ;;  %v1169_v2 = vmax.f32 %v2511_v53, 0.0  ;;  %v1170_v42 = vmax.f32 %v2515_v17, 0.0  ;;  %v1171_v59 = vmax.f32 %v2519_v39, 0.0  ;;  %v1172_v22 = vmax.f32 %v2523_v8, 0.0 }
 0x1ab   :  { %1214 = vst.msk [vmem:[%s2953_s4 + $0x78] sm:$0xff] %vm652_vm2, %v1150_v12  ;;  %1215 = vst.msk [vmem:[%s2953_s4 + $0x80] sm:$0xff] %vm652_vm2, %v1151_v58  ;;  %v1173_v41 = vmax.f32 %v2527_v0, 0.0  ;;  %v1174_v14 = vmax.f32 %v2531_v33, 0.0  ;;  %v1175_v32 = vmax.f32 %v2535_v7, 0.0  ;;  %v1176_v1 = vmax.f32 %v2539_v13, 0.0 }
 0x1ac   :  { %1216 = vst.msk [vmem:[%s2953_s4 + $0x88] sm:$0xff] %vm652_vm2, %v1152_v52  ;;  %1217 = vst.msk [vmem:[%s2953_s4 + $0x90] sm:$0xff] %vm652_vm2, %v1153_v49  ;;  %v1177_v24 = vmax.f32 %v2543_v29, 0.0  ;;  %v1178_v56 = vmax.f32 %v2547_v4, 0.0  ;;  %v1179_v15 = vmax.f32 %v2551_v26, 0.0  ;;  %v1180_v53 = vmax.f32 %v2555_v62, 0.0 }
 0x1ad   :  { %1218 = vst.msk [vmem:[%s2953_s4 + $0x98] sm:$0xff] %vm652_vm2, %v1154_v5  ;;  %1219 = vst.msk [vmem:[%s2953_s4 + $0xa0] sm:$0xff] %vm652_vm2, %v1155_v16  ;;  %v1181_v17 = vmax.f32 %v2559_v44, 0.0  ;;  %v3057_v39 = vld [vmem:[#allocation8_spill] sm:$0xff]  ;;  %v3058_v0 = vld [vmem:[#allocation13_spill] sm:$0xff]  ;;  %v1188_v23 = vmax.f32 %v2587_v43, 0.0 }
 0x1ae   :  { %1220 = vst.msk [vmem:[%s2953_s4 + $0xa8] sm:$0xff] %vm652_vm2, %v1156_v37  ;;  %1221 = vst.msk [vmem:[%s2953_s4 + $0xb0] sm:$0xff] %vm652_vm2, %v1157_v40  ;;  %v1182_v8 = vmax.f32 %v3057_v39, 0.0  ;;  %v1183_v33 = vmax.f32 %v3058_v0, 0.0  ;;  %v3059_v7 = vld [vmem:[#allocation12_spill] sm:$0xff]  ;;  %v3060_v29 = vld [vmem:[#allocation15_spill] sm:$0xff] }
 0x1af   :  { %1222 = vst.msk [vmem:[%s2953_s4 + $0xb8] sm:$0xff] %vm652_vm2, %v1158_v36  ;;  %1223 = vst.msk [vmem:[%s2953_s4 + $0xc0] sm:$0xff] %vm652_vm2, %v1159_v38  ;;  %v1184_v13 = vmax.f32 %v3059_v7, 0.0  ;;  %v1185_v4 = vmax.f32 %v3060_v29, 0.0  ;;  %v3061_v26 = vld [vmem:[#allocation17_spill] sm:$0xff]  ;;  %v3062_v44 = vld [vmem:[#allocation14_spill] sm:$0xff] }
 0x1b0   :  { %1224 = vst.msk [vmem:[%s2953_s4 + $0xc8] sm:$0xff] %vm652_vm2, %v1160_v54  ;;  %1225 = vst.msk [vmem:[%s2953_s4 + $0xd0] sm:$0xff] %vm652_vm2, %v1161_v3  ;;  %v1186_v62 = vmax.f32 %v3061_v26, 0.0  ;;  %v1187_v51 = vmax.f32 %v3062_v44, 0.0  ;;  %v1189_v31 = vmax.f32 %v2591_v9, 0.0  ;;  %v1190_v45 = vmax.f32 %v2595_v63, 0.0 }
 0x1b1   :  { %1226 = vst.msk [vmem:[%s2953_s4 + $0xd8] sm:$0xff] %vm652_vm2, %v1162_v46  ;;  %1227 = vst.msk [vmem:[%s2953_s4 + $0xe0] sm:$0xff] %vm652_vm2, %v1163_v61  ;;  %v1191_v43 = vmax.f32 %v2599_v35, 0.0  ;;  %v1192_v9 = vmax.f32 %v2603_v55, 0.0  ;;  %v3063_v63 = vld [vmem:[#allocation16_spill] sm:$0xff]  ;;  %v3064_v34 = vld [vmem:[#allocation19_spill] sm:$0xff] }
 0x1b2   :  { %1228 = vst.msk [vmem:[%s2953_s4 + $0xe8] sm:$0xff] %vm652_vm2, %v1164_v18  ;;  %1229 = vst.msk [vmem:[%s2953_s4 + $0xf0] sm:$0xff] %vm652_vm2, %v1165_v30  ;;  %v1193_v6 = vmax.f32 %v3063_v63, 0.0  ;;  %v1194_v60 = vmax.f32 %v3064_v34, 0.0  ;;  %v3065_v35 = vld [vmem:[#allocation21_spill] sm:$0xff]  ;;  %v3066_v47 = vld [vmem:[#allocation18_spill] sm:$0xff] }
 0x1b3   :  { %1230 = vst.msk [vmem:[%s2953_s4 + $0xf8] sm:$0xff] %vm652_vm2, %v1166_v11  ;;  %1231 = vst.msk [vmem:[%s2953_s4 + $0x100] sm:$0xff] %vm652_vm2, %v1167_v25  ;;  %v1195_v55 = vmax.f32 %v3065_v35, 0.0  ;;  %v1196_v20 = vmax.f32 %v3066_v47, 0.0  ;;  %v3067_v27 = vld [vmem:[#allocation20_spill] sm:$0xff]  ;;  %v1198_v57 = vmax.f32 %v2627_v19, 0.0 }
 0x1b4   :  { %1232 = vst.msk [vmem:[%s2953_s4 + $0x108] sm:$0xff] %vm652_vm2, %v1168_v50  ;;  %1233 = vst.msk [vmem:[%s2953_s4 + $0x110] sm:$0xff] %vm652_vm2, %v1169_v2  ;;  %v1197_v10 = vmax.f32 %v3067_v27, 0.0 }
 0x1b5   :  { %1234 = vst.msk [vmem:[%s2953_s4 + $0x118] sm:$0xff] %vm652_vm2, %v1170_v42  ;;  %1235 = vst.msk [vmem:[%s2953_s4 + $0x120] sm:$0xff] %vm652_vm2, %v1171_v59 }
 0x1b6   :  { %1236 = vst.msk [vmem:[%s2953_s4 + $0x128] sm:$0xff] %vm652_vm2, %v1172_v22  ;;  %1237 = vst.msk [vmem:[%s2953_s4 + $0x130] sm:$0xff] %vm652_vm2, %v1173_v41 }
 0x1b7   :  { %1238 = vst.msk [vmem:[%s2953_s4 + $0x138] sm:$0xff] %vm652_vm2, %v1174_v14  ;;  %1239 = vst.msk [vmem:[%s2953_s4 + $0x140] sm:$0xff] %vm652_vm2, %v1175_v32 }
 0x1b8   :  { %1240 = vst.msk [vmem:[%s2953_s4 + $0x148] sm:$0xff] %vm652_vm2, %v1176_v1  ;;  %1241 = vst.msk [vmem:[%s2953_s4 + $0x150] sm:$0xff] %vm652_vm2, %v1177_v24 }
 0x1b9   :  { %1242 = vst.msk [vmem:[%s2953_s4 + $0x158] sm:$0xff] %vm652_vm2, %v1178_v56  ;;  %1243 = vst.msk [vmem:[%s2953_s4 + $0x160] sm:$0xff] %vm652_vm2, %v1179_v15 }
 0x1ba   :  { %1244 = vst.msk [vmem:[%s2953_s4 + $0x168] sm:$0xff] %vm652_vm2, %v1180_v53  ;;  %1245 = vst.msk [vmem:[%s2953_s4 + $0x170] sm:$0xff] %vm652_vm2, %v1181_v17 }
 0x1bb   :  { %1246 = vst.msk [vmem:[%s2953_s4 + $0x178] sm:$0xff] %vm652_vm2, %v1182_v8  ;;  %1247 = vst.msk [vmem:[%s2953_s4 + $0x180] sm:$0xff] %vm652_vm2, %v1183_v33 }
 0x1bc   :  { %1248 = vst.msk [vmem:[%s2953_s4 + $0x188] sm:$0xff] %vm652_vm2, %v1184_v13  ;;  %1249 = vst.msk [vmem:[%s2953_s4 + $0x190] sm:$0xff] %vm652_vm2, %v1185_v4 }
 0x1bd   :  { %1250 = vst.msk [vmem:[%s2953_s4 + $0x198] sm:$0xff] %vm652_vm2, %v1186_v62  ;;  %1251 = vst.msk [vmem:[%s2953_s4 + $0x1a0] sm:$0xff] %vm652_vm2, %v1187_v51 }
 0x1be   :  { %1252 = vst.msk [vmem:[%s2953_s4 + $0x1a8] sm:$0xff] %vm652_vm2, %v1188_v23  ;;  %1253 = vst.msk [vmem:[%s2953_s4 + $0x1b0] sm:$0xff] %vm652_vm2, %v1189_v31 }
 0x1bf   :  { %1254 = vst.msk [vmem:[%s2953_s4 + $0x1b8] sm:$0xff] %vm652_vm2, %v1190_v45  ;;  %1255 = vst.msk [vmem:[%s2953_s4 + $0x1c0] sm:$0xff] %vm652_vm2, %v1191_v43 }
 0x1c0   :  { %1256 = vst.msk [vmem:[%s2953_s4 + $0x1c8] sm:$0xff] %vm652_vm2, %v1192_v9  ;;  %1257 = vst.msk [vmem:[%s2953_s4 + $0x1d0] sm:$0xff] %vm652_vm2, %v1193_v6 }
 0x1c1   :  { %1258 = vst.msk [vmem:[%s2953_s4 + $0x1d8] sm:$0xff] %vm652_vm2, %v1194_v60  ;;  %1259 = vst.msk [vmem:[%s2953_s4 + $0x1e0] sm:$0xff] %vm652_vm2, %v1195_v55 }
 0x1c2   :  { %1260 = vst.msk [vmem:[%s2953_s4 + $0x1e8] sm:$0xff] %vm652_vm2, %v1196_v20  ;;  %1261 = vst.msk [vmem:[%s2953_s4 + $0x1f0] sm:$0xff] %vm652_vm2, %v1197_v10 }
 0x1c3   :  { %1262 = vst.msk [vmem:[%s2953_s4 + $0x1f8] sm:$0xff] %vm652_vm2, %v1198_v57 }

</bundles_post_ra>
